<compile_context>
chip_gen: v5e
topology: v5e:2x2
jax: 0.10.0
libtpu: 0.0.40
codegen_flags: <defaults>
</compile_context>

<pallas_src>
import functools
import math

import jax
import jax.numpy as jnp
from jax import lax
from jax.experimental import pallas as pl
from jax.experimental.pallas import tpu as pltpu

_LANES = 128
_SUBLANES = 8
_CHUNK_ROWS = 256          # inner accumulate chunk; multiple of 32 -> OK for any packing
_NATIVE_DTYPES = (jnp.dtype(jnp.float32), jnp.dtype(jnp.bfloat16))


def _round_up(x, m):
    return ((x + m - 1) // m) * m


def _sublane_align(dtype):
    # Native sublane tile rows: f32 -> 8, bf16/f16 -> 16, int8/fp8 -> 32.
    itemsize = jnp.dtype(dtype).itemsize
    return _SUBLANES * max(1, 4 // itemsize)


def _bce_partial_kernel(yp_ref, yt_ref, o_ref, *, block_rows, chunk_rows,
                        needs_mask, valid_in_last):
    one = jnp.float32(1.0)
    eps = jnp.float32(1e-7)
    n_chunks = block_rows // chunk_rows

    def chunk_partial(r0, masked):
        # Load a (chunk_rows, 128) slice in its native dtype, upcast in vregs.
        yp = yp_ref[pl.ds(r0, chunk_rows), :].astype(jnp.float32)
        yt = yt_ref[pl.ds(r0, chunk_rows), :].astype(jnp.float32)
        yp = jnp.clip(yp, eps, one - eps)            # torch.clamp(y_pred, 1e-7, 1-1e-7)
        log_p = jnp.log(yp)
        log_q = jnp.log(one - yp)
        # y*log(p) + (1-y)*log(1-p) == log(1-p) + y*(log(p) - log(1-p))
        term = log_q + yt * (log_p - log_q)
        if masked:
            row = lax.broadcasted_iota(jnp.int32, (chunk_rows, _LANES), 0)
            lane = lax.broadcasted_iota(jnp.int32, (chunk_rows, _LANES), 1)
            lidx = (row + r0) * _LANES + lane        # block-local element index
            term = jnp.where(lidx < valid_in_last, term, jnp.float32(0.0))
        # (chunk_rows,128) -> (8,128) partial: pure VPU adds, stays in vregs.
        return jnp.sum(term.reshape(chunk_rows // _SUBLANES, _SUBLANES, _LANES),
                       axis=0)

    def block_partial(masked):
        if n_chunks == 1:
            return chunk_partial(0, masked)

        def body(c, acc):
            r0 = pl.multiple_of(c * chunk_rows, chunk_rows)
            return acc + chunk_partial(r0, masked)

        return lax.fori_loop(0, n_chunks, body,
                             jnp.zeros((_SUBLANES, _LANES), jnp.float32),
                             unroll=True)

    if needs_mask:
        is_last = pl.program_id(0) == pl.num_programs(0) - 1

        @pl.when(is_last)
        def _():
            o_ref[...] = block_partial(True)[None, :, :]

        @pl.when(jnp.logical_not(is_last))
        def _():
            o_ref[...] = block_partial(False)[None, :, :]
    else:
        o_ref[...] = block_partial(False)[None, :, :]


def custom_bce_loss(y_pred, y_true, *, max_block_rows=8192, target_blocks=8,
                    chunk_rows=_CHUNK_ROWS):
    """-mean(y_true*log(clamp(y_pred)) + (1-y_true)*log(1-clamp(y_pred)))."""
    assert y_pred.shape == y_true.shape
    total = math.prod(y_pred.shape)
    assert total > 0

    def _prep(x):
        # Stream f32 / bf16 natively; anything else (ints, f16, f64) -> f32.
        if jnp.dtype(x.dtype) not in _NATIVE_DTYPES:
            x = x.astype(jnp.float32)
        return jnp.ravel(x)

    yp = _prep(y_pred)
    yt = _prep(y_true)

    row_align = max(_sublane_align(yp.dtype), _sublane_align(yt.dtype))
    chunk_rows = _round_up(max(chunk_rows, row_align), row_align)

    rows = pl.cdiv(total, _LANES)

    # Adaptive block size: aim for >= target_blocks grid steps (pipeline
    # overlap + both TCs on v7x), cap per-block footprint at max_block_rows.
    block_rows = _round_up(pl.cdiv(rows, target_blocks), row_align)
    block_rows = max(row_align,
                     min(block_rows, max_block_rows, _round_up(rows, row_align)))
    if block_rows > chunk_rows:
        block_rows = _round_up(block_rows, chunk_rows)
    chunk_rows = min(chunk_rows, block_rows)
    assert block_rows % chunk_rows == 0

    num_blocks = pl.cdiv(rows, block_rows)
    padded_total = num_blocks * block_rows * _LANES
    needs_mask = padded_total != total
    valid_in_last = total - (num_blocks - 1) * block_rows * _LANES  # static int

    use_pad = (total % _LANES != 0) or (rows < block_rows)
    if not use_pad:
        # Lane-aligned: reshape is free (no copy).  A ragged last block is
        # handled by the partial-block window + in-kernel mask.
        yp2 = yp.reshape(rows, _LANES)
        yt2 = yt.reshape(rows, _LANES)
    else:
        # Odd element count (or tiny input): pad to a whole number of blocks.
        # TODO(synk): this materialises one extra HBM copy of both inputs;
        # only odd-shaped inputs hit it (the aligned path above avoids it).
        pad = padded_total - total
        yp2 = jnp.pad(yp, (0, pad), constant_values=0.5).reshape(-1, _LANES)
        yt2 = jnp.pad(yt, (0, pad), constant_values=0.0).reshape(-1, _LANES)

    kernel = functools.partial(
        _bce_partial_kernel,
        block_rows=block_rows,
        chunk_rows=chunk_rows,
        needs_mask=needs_mask,
        valid_in_last=valid_in_last,
    )

    partials = pl.pallas_call(
        kernel,
        out_shape=jax.ShapeDtypeStruct((num_blocks, _SUBLANES, _LANES),
                                       jnp.float32),
        grid_spec=pltpu.PrefetchScalarGridSpec(
            num_scalar_prefetch=0,
            grid=(num_blocks,),
            in_specs=[
                pl.BlockSpec((block_rows, _LANES), lambda i: (i, 0)),
                pl.BlockSpec((block_rows, _LANES), lambda i: (i, 0)),
            ],
            out_specs=pl.BlockSpec((1, _SUBLANES, _LANES), lambda i: (i, 0, 0)),
        ),
        compiler_params=pltpu.CompilerParams(
            # Independent per-block partials -> parallel axis (2 TCs on v7x).
            dimension_semantics=("parallel",),
            # Worst case: 2 inputs x 2 buffers x 4 MiB (f32, 8192 rows) = 16 MiB
            # live; 48 MiB cap keeps full pipeline depth on v5e/v6e/v7x.
            vmem_limit_bytes=48 * 1024 * 1024,
        ),
    )(yp2, yt2)

    # Tiny final reduce + mean + negation in plain XLA.  1/total is computed
    # in double precision and rounded once to f32 (exact-count concern).
    inv_n = jnp.float32(1.0 / total)
    return -(jnp.sum(partials) * inv_n)


if __name__ == "__main__":
    key = jax.random.PRNGKey(0)
    keys = jax.random.split(key, 8)

    def reference(y_pred, y_true):
        yp = jnp.clip(y_pred.astype(jnp.float32), 1e-7, 1.0 - 1e-7)
        yt = y_true.astype(jnp.float32)
        return -jnp.mean(yt * jnp.log(yp) + (1.0 - yt) * jnp.log(1.0 - yp))

    def check(loss, ref):
        assert jnp.allclose(loss, ref, rtol=1e-5, atol=2e-6), (loss, ref)

    # Case 1: small lane-aligned f32 input (multi-block, no mask).
    yp1 = jax.nn.sigmoid(jax.random.normal(keys[0], (16, 128), dtype=jnp.float32))
    yt1 = (jax.random.uniform(keys[1], (16, 128)) > 0.5).astype(jnp.float32)
    check(jax.block_until_ready(custom_bce_loss(yp1, yt1)), reference(yp1, yt1))

    # Case 2: odd higher-rank shape -> pad + masked-last-block path.
    yp2 = jax.nn.sigmoid(jax.random.normal(keys[2], (4, 3, 17), dtype=jnp.float32))
    yt2 = (jax.random.uniform(keys[3], (4, 3, 17)) > 0.5).astype(jnp.float32)
    check(jax.block_until_ready(custom_bce_loss(yp2, yt2)), reference(yp2, yt2))

    # Case 3: native bf16 streaming (upcast happens in-kernel).
    yp3 = jax.nn.sigmoid(jax.random.normal(keys[4], (8, 256))).astype(jnp.bfloat16)
    yt3 = (jax.random.uniform(keys[5], (8, 256)) > 0.5).astype(jnp.bfloat16)
    check(jax.block_until_ready(custom_bce_loss(yp3, yt3)), reference(yp3, yt3))

    # Case 4: lane-aligned but ragged rows -> copy-free path with masked last
    # block, plus chunked in-kernel accumulation (fori_loop, n_chunks > 1).
    yp4 = jax.nn.sigmoid(jax.random.normal(keys[6], (130, 128), dtype=jnp.float32))
    yt4 = (jax.random.uniform(keys[7], (130, 128)) > 0.5).astype(jnp.float32)
    check(jax.block_until_ready(custom_bce_loss(yp4, yt4, chunk_rows=8)),
          reference(yp4, yt4))

    print("KERNEL_OK")
</pallas_src>

<mosaic_0001>
module attributes {stable_mosaic.version = 11 : i64} {
  func.func @_bce_partial_kernel(%arg0: i32, %arg1: memref<8x128xf32, #tpu.memory_space<vmem>>, %arg2: memref<8x128xf32, #tpu.memory_space<vmem>>, %arg3: memref<1x8x128xf32, #tpu.memory_space<vmem>>) attributes {dimension_semantics = [#tpu.dimension_semantics<parallel>], iteration_bounds = array<i64: 2>, scalar_prefetch = 0 : i64, scratch_operands = 0 : i64, tpu.core_type = #tpu.core_type<tc>, window_params = [{transform_indices = @transform_0, window_bounds = array<i64: 8, 128>}, {transform_indices = @transform_1, window_bounds = array<i64: 8, 128>}, {transform_indices = @transform_2, window_bounds = array<i64: 1, 8, 128>}]} {
    %c0 = arith.constant 0 : index
    %c0_0 = arith.constant 0 : index
    %0 = vector.load %arg1[%c0, %c0_0] : memref<8x128xf32, #tpu.memory_space<vmem>>, vector<8x128xf32>
    %c0_1 = arith.constant 0 : index
    %c0_2 = arith.constant 0 : index
    %1 = vector.load %arg2[%c0_1, %c0_2] : memref<8x128xf32, #tpu.memory_space<vmem>>, vector<8x128xf32>
    %cst = arith.constant 1.000000e+00 : f32
    %cst_3 = arith.constant 1.000000e-07 : f32
    %2 = arith.subf %cst, %cst_3 : f32
    %cst_4 = arith.constant 1.000000e-07 : f32
    %3 = vector.broadcast %cst_4 : f32 to vector<8x128xf32>
    %4 = arith.maximumf %3, %0 : vector<8x128xf32>
    %5 = vector.broadcast %2 : f32 to vector<8x128xf32>
    %6 = arith.minimumf %5, %4 : vector<8x128xf32>
    %7 = math.log %6 : vector<8x128xf32>
    %cst_5 = arith.constant 1.000000e+00 : f32
    %8 = vector.broadcast %cst_5 : f32 to vector<8x128xf32>
    %9 = arith.subf %8, %6 : vector<8x128xf32>
    %10 = math.log %9 : vector<8x128xf32>
    %11 = arith.subf %7, %10 : vector<8x128xf32>
    %12 = arith.mulf %1, %11 : vector<8x128xf32>
    %13 = arith.addf %10, %12 : vector<8x128xf32>
    %14 = vector.shape_cast %13 : vector<8x128xf32> to vector<1x8x128xf32>
    %cst_6 = arith.constant dense<0.000000e+00> : vector<8x128xf32>
    %15 = vector.multi_reduction <add>, %14, %cst_6 [0] : vector<1x8x128xf32> to vector<8x128xf32>
    %16 = vector.shape_cast %15 : vector<8x128xf32> to vector<1x8x128xf32>
    %c0_7 = arith.constant 0 : index
    %c0_8 = arith.constant 0 : index
    %c0_9 = arith.constant 0 : index
    %17 = vector.load %arg3[%c0_7, %c0_8, %c0_9] : memref<1x8x128xf32, #tpu.memory_space<vmem>>, vector<1x8x128xf32>
    tpu.vector_store %arg3[%c0_7, %c0_8, %c0_9], %16 {strides = array<i32>} : memref<1x8x128xf32, #tpu.memory_space<vmem>>, vector<1x8x128xf32>,
    return
  }
  func.func @transform_0(%arg0: i32) -> (i32, i32) {
    %c0_i32 = arith.constant 0 : i32
    %c0_i32_0 = arith.constant 0 : i32
    return %arg0, %c0_i32 : i32, i32
  }
  func.func @transform_1(%arg0: i32) -> (i32, i32) {
    %c0_i32 = arith.constant 0 : i32
    %c0_i32_0 = arith.constant 0 : i32
    return %arg0, %c0_i32 : i32, i32
  }
  func.func @transform_2(%arg0: i32) -> (i32, i32, i32) {
    %c0_i32 = arith.constant 0 : i32
    %c0_i32_0 = arith.constant 0 : i32
    %c0_i32_1 = arith.constant 0 : i32
    return %arg0, %c0_i32, %c0_i32_0 : i32, i32, i32
  }
}

</mosaic_0001>

<bundles_post_ra>
// kernel: tpu_custom_call.1
= control target key start
LH: loop header
LB: loop body
LE: loop exit
PB: predicated region body
PF: predicated region fallthrough
CT: control target
= control target key end

     0   :  { %7 = vsyncpa [#allocation3], 0  ;;  %s705_s0 = inlined_call_operand.hbm [shape: f32[16,128], index: 0, kind: input, shape index: {}]   ;;  %s706_s1 = inlined_call_operand.hbm [shape: f32[16,128], index: 1, kind: input, shape index: {}]   ;;  %s707_s2 = inlined_call_operand.hbm [shape: f32[2,8,128], index: 2, kind: output, shape index: {}]  }
   0x1   :  { %9 = vsyncpa [#allocation3 + $0x1], 0 }
   0x2   :  { %10 = vsyncpa [#allocation6], 0 }
   0x3   :  { %12 = vsyncpa [#allocation6 + $0x1], 0 }
   0x4   :  { %13 = vsyncpa [#allocation4], 0 }
   0x5   :  { %15 = vsyncpa [#allocation4 + $0x1], 0  ;;  %s540_s9 = smov 0   ;;  %s542_s10 = smov 0  }
   0x6   :  { %s544_s11 = smov 0   ;;  %s546_s12 = smov 0  }
   0x7 LB: > { %s561_s13 = sadd.s32 4294967295, %s523_s12   ;;  %s323_s14 = sadd.s32 4294967294, %s523_s12   ;;  %s523_s12 = sphi %s546_s12, %s718_s12   ;;  %s519_s11 = sphi %s544_s11, %s717_s11   ;;  %s515_s10 = sphi %s542_s10, %s716_s10   ;;  %s511_s9 = sphi %s540_s9, %s715_s9  }
   0x8   : > { %s565_s15 = sadd.s32 1, %s523_s12   ;;  %s28_s16 = sadd.s32 1, %s519_s11 }
   0x9   : > { %s25_s17 = ssub.s32 %s523_s12, %s565_s15  ;;  %p35_p0 = scmp.ne.s32.totalorder %s519_s11, %s515_s10 }
   0xa   : > { %p26_p1 = scmp.eq.s32.totalorder %s25_s17, 0  ;;  %p36_p2 = scmp.eq.s32.totalorder %s523_s12, 0 }
   0xb   : > { %p41_p3 = scmp.ne.s32.totalorder %s515_s10, %s511_s9  ;;  %p42_p4 = scmp.eq.s32.totalorder %s561_s13, 0 }
   0xc   : > { %s577_s18 = scalar_select %p26_p1, %s519_s11, %s28_s16  }
   0xd   : > { %p579_p5 = por %p36_p2, %p35_p0  ;;  %p583_p6 = por %p42_p4, %p41_p3 }
   0xe   : > { %p91_p7 = scmp.eq.s32.totalorder %s561_s13, 1  ;;  %p97_p8 = scmp.eq.s32.totalorder %s323_s14, 1 }
   0xf   : > { %p355_p10 = scmp.lt.s32.totalorder %s523_s12, 2  ;;  %s599_s23 = sand.u32 1, %s519_s11  }
  0x10   : > { %p590_p11 = por %p91_p7, %p35_p0  ;;  %p594_p12 = por %p97_p8, %p41_p3 }
  0x11   : > { %s327_s24 = sshll.u32 %s523_s12, 3  ;;  %s326_s25 = sshll.u32 %s599_s23, 3 }
  0x12   : > { %s125_s28 = scalar_lea.hbm %s705_s0, %s327_s24  ;;  %s121_s30 = scalar_lea.vmem [#allocation2], %s326_s25 }
  0x13   : > { %s127_s29 = sshll.u32 %s125_s28, 4  ;;  %s129_s3 = sshll.u32 %s121_s30, 4  ;;  %s128_s29 = int_to_ptr.hbm [resolvable:$true] %s127_s29  ;;  %s130_s3 = int_to_ptr.vmem [resolvable:$true] %s129_s3 }
  0x14   : > { %p608_p13 = pnand %p355_p10, %p579_p5  ;;  %p330_p0 = scmp.ge.s32.totalorder %s523_s12, 1 }
  0x15   : > { %p153_p1 = scmp.lt.s32.totalorder %s523_s12, 3  ;;  %s118_s5 = scalar_lea.sflag [#allocation3], %s599_s23 }
  0x16   : > { %s393_s6 = sshra.s32 %s128_s29, 4  ;;  %p397_p3 = pneg %p608_p13  ;;  %s394_s6 = int_to_ptr.hbm [resolvable:$true] %s393_s6 }
  0x17   : > { %s395_s7 = scalar_lea.hbm %s394_s6, 8  ;;  %s400_s16 = scalar_lea.hbm %s705_s0, 16 }
  0x18   : > { %p396_p2 = scmp.ne.s32.totalorder %s394_s6, %s395_s7  ;;  %p401_p5 = scmp.lt.s32.totalorder %s394_s6, %s705_s0 }
  0x19   : > { %p402_p8 = scmp.lt.s32.totalorder %s400_s16, %s395_s7 }
  0x1a   : > { %p398_p4 = pnand %p397_p3, %p396_p2 }
  0x1b   : > { %p403_p10 = por %p402_p8, %p401_p5 }
  0x1c   : > { %p399_p7 = pneg %p398_p4 }
  0x1e   : > { %p404_p9 = pnand %p403_p10, %p399_p7 }
  0x20   : > { %407 = shalt.err (!%p404_p9)
}
  0x21   : > { %347 = dma.hbm_to_vmem [thread:$0]  (!%p608_p13), %s128_s29, 128, %s130_s3, %s118_s5  }
  0x22   : > { %p632_p2 = pnand %p330_p0, %p153_p1  ;;  %s144_s30 = scalar_lea.hbm %s706_s1, %s327_s24 }
  0x23   : > { %s146_s6 = sshll.u32 %s144_s30, 4  ;;  %s140_s7 = scalar_lea.vmem [#allocation5], %s326_s25  ;;  %s147_s6 = int_to_ptr.hbm [resolvable:$true] %s146_s6 }
  0x24   : > { %s148_s8 = sshll.u32 %s140_s7, 4  ;;  %s137_s14 = scalar_lea.sflag [#allocation6], %s599_s23  ;;  %s149_s8 = int_to_ptr.vmem [resolvable:$true] %s148_s8 }
  0x25   : > { %s423_s16 = sshra.s32 %s147_s6, 4  ;;  %s430_s5 = scalar_lea.hbm %s706_s1, 16  ;;  %s424_s16 = int_to_ptr.hbm [resolvable:$true] %s423_s16 }
  0x26   : > { %s425_s17 = scalar_lea.hbm %s424_s16, 8  ;;  %p431_p4 = scmp.lt.s32.totalorder %s424_s16, %s706_s1 }
  0x27   : > { %p426_p9 = scmp.ne.s32.totalorder %s424_s16, %s425_s17  ;;  %p432_p7 = scmp.lt.s32.totalorder %s430_s5, %s425_s17 }
  0x29   : > { %p428_p0 = pnand %p426_p9, %p397_p3  ;;  %p433_p5 = por %p432_p7, %p431_p4 }
  0x2b   : > { %p429_p1 = pneg %p428_p0 }
  0x2d   : > { %p434_p8 = pnand %p433_p5, %p429_p1 }
  0x2f   : > { %437 = shalt.err (!%p434_p8)
}
  0x30   : > { %350 = dma.hbm_to_vmem [thread:$0]  (!%p608_p13), %s147_s6, 128, %s149_s8, %s137_s14  }
  0x31   : > { %157 = sbr.rel (%p632_p2) target bundleno = 82 (0x52), region = 28  ;;  %s654_s23 = sand.u32 (!%p632_p2), 1, %s515_s10  }
  0x32   : > { %s657_s25 = sshll.u32 (!%p632_p2), %s654_s23, 3  ;;  %s160_s27 = scalar_lea.sflag (!%p632_p2), [#allocation3], %s654_s23 }
  0x33   : > { %s163_s28 = scalar_lea.vmem (!%p632_p2), [#allocation2], %s657_s25 }
  0x36   : > { %498 = dma.done.wait (%p583_p6), %s160_s27, 128  }
  0x37   : > { %500 = vsyncadd (%p583_p6), %s160_s27, 4294967168  ;;  %s170_s4 = scalar_lea.sflag [#allocation6], %s654_s23  ;;  %s173_s26 = scalar_lea.vmem [#allocation5], %s657_s25 }
  0x38   : > { %502 = dma.done.wait (%p583_p6), %s170_s4, 128  }
  0x39   : > { %504 = vsyncadd (%p583_p6), %s170_s4, 4294967168  ;;  %v200_v0 = vld [vmem:[%s163_s28] sm:$0xff]  ;;  %s335_s30 = sshll.u32 %s561_s13, 3  ;;  %v201_v8 = vld [vmem:[%s173_s26] sm:$0xff]  ;;  %s199_s20 = scalar_lea.vmem [#allocation7], %s657_s25 }
  0x3a   : > { %v202_v1 = vmax.f32 %v200_v0, 1e-07  ;;  %s225_s8 = scalar_lea.hbm %s707_s2, %s335_s30  ;;  %s227_s14 = sshll.u32 %s199_s20, 4  ;;  %s228_s14 = int_to_ptr.vmem [resolvable:$true] %s227_s14 }
  0x3b   : > { %s229_s16 = sshll.u32 %s225_s8, 4  ;;  %s215_s17 = scalar_lea.sflag [#allocation4], %s654_s23  ;;  %s230_s16 = int_to_ptr.hbm [resolvable:$true] %s229_s16 }
  0x3c   : > { %v203_v2 = vmin.f32 %v202_v1, 0.9999999  ;;  %s467_s13 = sshra.s32 %s230_s16, 4  ;;  %s473_s19 = scalar_lea.hbm %s707_s2, 16  ;;  %s468_s13 = int_to_ptr.hbm [resolvable:$true] %s467_s13 }
  0x3d   : > { %s469_s29 = scalar_lea.hbm %s468_s13, 8  ;;  %p474_p10 = scmp.lt.s32.totalorder %s468_s13, %s707_s2 }
  0x3e   : > { %389 = vlog2.f32 %v203_v2  ;;  %v206_v3 = vsub.f32 1.0, %v203_v2  ;;  %p470_p6 = scmp.ne.s32.totalorder %s468_s13, %s469_s29  ;;  %p475_p2 = scmp.lt.s32.totalorder %s473_s19, %s469_s29 }
  0x40   : > { %391 = vlog2.f32 %v206_v3  ;;  %p471_p13 = pnand %p470_p6, %p590_p11  ;;  %p476_p9 = por %p475_p2, %p474_p10 }
  0x42   : > { %p472_p3 = pneg %p471_p13 }
  0x44   : > { %v390_v4 = vpop.eup %389  ;;  %p477_p0 = pnand %p476_p9, %p472_p3 }
  0x45   : > { %v205_v5 = vmul.f32 0.6931472, %v390_v4 }
  0x46   : > { %v392_v6 = vpop.eup %391 }
  0x47   : > { %v208_v7 = vmul.f32 0.6931472, %v392_v6 }
  0x49   : > { %v209_v9 = vsub.f32 %v205_v5, %v208_v7 }
  0x4b   : > { %v210_v10 = vmul.f32 %v209_v9, %v201_v8 }
  0x4d   : > { %v211_v11 = vadd.f32 %v210_v10, %v208_v7 }
  0x4f   : > { %213 = vst [vmem:[%s199_s20] sm:$0xff] %v211_v11 }
  0x50   : > { %480 = shalt.err (!%p477_p0)
}
  0x51   : > { %342 = dma.vmem_to_hbm [thread:$0]  (%p590_p11), %s228_s14, 128, %s230_s16, %s215_s17  }
  0x52 PF: > { %s241_s23 = sand.u32 1, %s511_s9   ;;  %p714_p1 = scmp.ge.s32.totalorder %s523_s12, 2 }
  0x53   : > { %s242_s27 = scalar_lea.sflag [#allocation4], %s241_s23 }
  0x54   : > { %p352_p4 = pnand %p714_p1, %p594_p12 }
  0x56   : > { %p353_p7 = pneg %p352_p4 }
  0x58   : > { %506 = dma.done.wait (%p353_p7), %s242_s27, 128  }
  0x59   : > { %508 = vsyncadd (%p353_p7), %s242_s27, 4294967168  ;;  %p18_p5 = scmp.ge.s32.totalorder %s565_s15, 4   ;;  %s715_s9 = smov %s515_s10 }
  0x5a   : > { %s716_s10 = smov %s519_s11  ;;  %s717_s11 = smov %s577_s18 }
  0x5b   : > { %s718_s12 = smov %s565_s15  ;;  %20 = sbr.rel (!%p18_p5) target bundleno = 7 (0x7), region = 86 }
  0x60   :  { %248 = vsyncpa [#allocation3], 1 }
  0x61   :  { %250 = vsyncpa [#allocation3 + $0x1], 1 }
  0x62   :  { %251 = vsyncpa [#allocation6], 1 }
  0x63   :  { %253 = vsyncpa [#allocation6 + $0x1], 1 }
  0x64   :  { %254 = vsyncpa [#allocation4], 1 }
  0x65   :  { %256 = vsyncpa [#allocation4 + $0x1], 1 }

</bundles_post_ra>
